<compile_context>
chip_gen: v7x
topology: tpu7x:2x2x1
jax: 0.10.0
libtpu: 0.0.40
codegen_flags: <defaults>
</compile_context>

<pallas_src>
import jax
import jax.numpy as jnp
from jax.experimental import pallas as pl
from jax.experimental.pallas import tpu as pltpu


def _se_kernel(x_ref, wrt_ref, br_ref, wet_ref, be_ref, o_ref):
    """One grid step: Bt samples, all of C and HW resident in VMEM.

    x_ref  : (Bt, C, HW)   activations (any float dtype)
    wrt_ref: (C, Crd)      conv_reduce weight, pre-transposed
    br_ref : (1, Crd)      conv_reduce bias (lane-dense row)
    wet_ref: (Crd, C)      conv_expand weight, pre-transposed
    be_ref : (1, C)        conv_expand bias (lane-dense row)
    o_ref  : (Bt, C, HW)
    """
    inv_hw = 1.0 / x_ref.shape[-1]

    # Squeeze: global average pool over the spatial (lane) axis -> (Bt, C).
    # The f32 upcast is folded into the reduction; no tile-sized f32 value
    # stays live past this statement.
    pooled = jnp.sum(x_ref[...].astype(jnp.float32), axis=-1) * inv_hw       # (Bt, C)

    # conv_reduce (1x1 conv == channel matmul) + bias, then ReLU6.
    se = jnp.dot(pooled, wrt_ref[...],
                 preferred_element_type=jnp.float32) + br_ref[...]           # (Bt, Crd)
    se = jnp.clip(se, 0.0, 6.0)

    # conv_expand + bias, then sigmoid gate (all f32).
    se = jnp.dot(se, wet_ref[...],
                 preferred_element_type=jnp.float32) + be_ref[...]           # (Bt, C)
    gate = jax.nn.sigmoid(se).astype(o_ref.dtype)                            # (Bt, C)

    # Excite: re-read x and gate in the native I/O dtype (bf16 stays bf16 on
    # v6e/v7x; for f32 inputs this matches the previous f32 path exactly).
    o_ref[...] = x_ref[...] * gate[:, :, None]


def _vmem_cap_bytes():
    """~70% of physical VMEM (v5e/v6e: 128 MiB, v7x: 64 MiB); safe fallback."""
    try:
        cap = getattr(pltpu.get_tpu_info(), "vmem_capacity_bytes", None)
        if cap:
            return int(0.7 * cap)
    except Exception:
        pass
    return 45 * 1024 * 1024  # fits under v7x's 64 MiB physical VMEM


def _choose_batch_tile(B, per_sample_elems, dtype_bytes, vmem_cap,
                       target_bytes=4 << 20):
    """Pick (Bt, grid, tile_footprint_bytes).

    * ~target_bytes per x tile (amortizes grid-step overhead on v6e/v7x;
      harmless on v5e as long as enough grid steps remain).
    * >= 4 grid steps when B >= 4 (>= 2 per v7x TensorCore), >= 2 for B in
      [2, 3], so the BlockSpec double-buffer can actually overlap DMA/compute.
    * Tile footprint (double-buffered in + out + transient f32 pool pass)
      must fit under the chip-aware VMEM cap.
    * grid = cdiv(B, Bt): non-dividing batch sizes get a padded last block
      instead of collapsing toward Bt = 1.
    """
    per_sample_bytes = per_sample_elems * dtype_bytes
    bt = max(1, min(B, target_bytes // max(per_sample_bytes, 1)))
    if B >= 4:
        bt = min(bt, B // 4)
    elif B >= 2:
        bt = min(bt, B // 2)
    bt = max(bt, 1)

    def footprint(b):
        # double-buffered input + output tiles, transient f32 pooling pass,
        # plus ~2 MiB headroom for compiler internal scratch / SE vectors.
        return (4 * b * per_sample_bytes) + (b * per_sample_elems * 4) + (2 << 20)

    while bt > 1 and footprint(bt) > vmem_cap:
        bt -= 1
    return int(bt), int(pl.cdiv(B, bt)), int(footprint(bt))


@jax.jit
def squeeze_excite(x_nchw, w_reduce, b_reduce, w_expand, b_expand):
    """x_nchw: (B, C, H, W) float. Returns (B, C, H, W) of the same dtype."""
    B, C, H, W = x_nchw.shape
    HW = H * W
    Crd = w_reduce.shape[0]

    x = x_nchw.reshape(B, C, HW)
    dtype_bytes = jnp.dtype(x.dtype).itemsize
    vmem_cap = _vmem_cap_bytes()
    Bt, grid, tile_footprint = _choose_batch_tile(B, C * HW, dtype_bytes, vmem_cap)

    # Pre-transpose weights so in-kernel matmuls are row-major; biases as
    # lane-dense (1, N) rows instead of (N, 1) columns.
    wrt = w_reduce.T                     # (C, Crd)
    wet = w_expand.T                     # (Crd, C)
    br = b_reduce.reshape(1, Crd)
    be = b_expand.reshape(1, C)

    weight_bytes = (C * Crd * 2 + C + Crd) * 4
    vmem_limit = int(min(vmem_cap,
                         max(16 * 1024 * 1024, tile_footprint + weight_bytes)))

    cost = pl.CostEstimate(
        flops=4 * B * C * Crd + 3 * B * C * HW,
        transcendentals=B * C,
        bytes_accessed=2 * B * C * HW * dtype_bytes + weight_bytes,
    )

    out = pl.pallas_call(
        _se_kernel,
        out_shape=jax.ShapeDtypeStruct((B, C, HW), x.dtype),
        grid_spec=pltpu.PrefetchScalarGridSpec(
            num_scalar_prefetch=0,
            grid=(grid,),
            in_specs=[
                pl.BlockSpec((Bt, C, HW), lambda b: (b, 0, 0)),   # x batch tile
                pl.BlockSpec((C, Crd), lambda b: (0, 0)),         # w_reduce^T (resident)
                pl.BlockSpec((1, Crd), lambda b: (0, 0)),         # b_reduce row
                pl.BlockSpec((Crd, C), lambda b: (0, 0)),         # w_expand^T (resident)
                pl.BlockSpec((1, C), lambda b: (0, 0)),           # b_expand row
            ],
            out_specs=pl.BlockSpec((Bt, C, HW), lambda b: (b, 0, 0)),
        ),
        compiler_params=pltpu.CompilerParams(
            dimension_semantics=("parallel",),
            vmem_limit_bytes=vmem_limit),
        cost_estimate=cost,
    )(x, wrt, br, wet, be)

    return out.reshape(B, C, H, W)


def _reference(x, w_reduce, b_reduce, w_expand, b_expand):
    # Pure-JAX reference of the PyTorch forward (NCHW).
    pooled = x.mean(axis=(2, 3), keepdims=True)                      # (B,C,1,1)
    se = jnp.einsum('oc,bcij->boij', w_reduce, pooled) + b_reduce[None, :, None, None]
    se = jnp.clip(se, 0.0, 6.0)                                      # ReLU6
    se = jnp.einsum('oc,bcij->boij', w_expand, se) + b_expand[None, :, None, None]
    return x * jax.nn.sigmoid(se)


if __name__ == "__main__":
    # Shapes implied by the module: in_chs=4, rd_ratio=0.25 -> rd_channels=round(1.0)=1
    B, C, H, W = 2, 4, 16, 16
    rd_ratio = 0.25
    Crd = max(1, round(C * rd_ratio))

    key = jax.random.PRNGKey(0)
    k_x, k_wr, k_br, k_we, k_be = jax.random.split(key, 5)

    x = jax.random.normal(k_x, (B, C, H, W), dtype=jnp.float32)
    # Deterministic synthetic parameters (1x1 conv weights == dense channel maps).
    w_reduce = 0.2 * jax.random.normal(k_wr, (Crd, C), dtype=jnp.float32)
    b_reduce = 0.1 * jax.random.normal(k_br, (Crd,), dtype=jnp.float32)
    w_expand = 0.2 * jax.random.normal(k_we, (C, Crd), dtype=jnp.float32)
    b_expand = 0.1 * jax.random.normal(k_be, (C,), dtype=jnp.float32)

    out = squeeze_excite(x, w_reduce, b_reduce, w_expand, b_expand)
    out = jax.block_until_ready(out)

    ref = _reference(x, w_reduce, b_reduce, w_expand, b_expand)
    assert out.shape == (B, C, H, W)
    assert jnp.allclose(out, ref, atol=1e-5, rtol=1e-5), "mismatch vs reference"

    print("KERNEL_OK")
</pallas_src>

<mosaic_0001>
module attributes {stable_mosaic.version = 11 : i64} {
  func.func @_se_kernel(%arg0: i32, %arg1: memref<1x4x256xf32, #tpu.memory_space<vmem>>, %arg2: memref<4x1xf32, #tpu.memory_space<vmem>>, %arg3: memref<1x1xf32, #tpu.memory_space<vmem>>, %arg4: memref<1x4xf32, #tpu.memory_space<vmem>>, %arg5: memref<1x4xf32, #tpu.memory_space<vmem>>, %arg6: memref<1x4x256xf32, #tpu.memory_space<vmem>>) attributes {dimension_semantics = [#tpu.dimension_semantics<parallel>], iteration_bounds = array<i64: 2>, scalar_prefetch = 0 : i64, scratch_operands = 0 : i64, tpu.core_type = #tpu.core_type<tc>, window_params = [{transform_indices = @transform_0, window_bounds = array<i64: 1, 4, 256>}, {pipeline_mode = #tpu.pipeline_mode<synchronous>, transform_indices = @transform_1, window_bounds = array<i64: 4, 1>}, {pipeline_mode = #tpu.pipeline_mode<synchronous>, transform_indices = @transform_2, window_bounds = array<i64: 1, 1>}, {pipeline_mode = #tpu.pipeline_mode<synchronous>, transform_indices = @transform_3, window_bounds = array<i64: 1, 4>}, {pipeline_mode = #tpu.pipeline_mode<synchronous>, transform_indices = @transform_4, window_bounds = array<i64: 1, 4>}, {transform_indices = @transform_5, window_bounds = array<i64: 1, 4, 256>}]} {
    %c0 = arith.constant 0 : index
    %c0_0 = arith.constant 0 : index
    %c0_1 = arith.constant 0 : index
    %0 = vector.load %arg1[%c0, %c0_0, %c0_1] : memref<1x4x256xf32, #tpu.memory_space<vmem>>, vector<1x4x256xf32>
    %cst = arith.constant dense<0.000000e+00> : vector<1x4xf32>
    %1 = vector.multi_reduction <add>, %0, %cst [2] : vector<1x4x256xf32> to vector<1x4xf32>
    %cst_2 = arith.constant 3.906250e-03 : f32
    %2 = vector.broadcast %cst_2 : f32 to vector<1x4xf32>
    %3 = arith.mulf %1, %2 : vector<1x4xf32>
    %c0_3 = arith.constant 0 : index
    %c0_4 = arith.constant 0 : index
    %4 = vector.load %arg2[%c0_3, %c0_4] : memref<4x1xf32, #tpu.memory_space<vmem>>, vector<4x1xf32>
    %cst_5 = arith.constant dense<0.000000e+00> : vector<1x1xf32>
    %5 = tpu.matmul %3, %4, %cst_5 {dimension_numbers = #tpu.dot_dimension_numbers<[1], [0], [0], [1], [0, 0, 1, 1], [], []>} : vector<1x4xf32>, vector<4x1xf32>, vector<1x1xf32> -> vector<1x1xf32>
    %c0_6 = arith.constant 0 : index
    %c0_7 = arith.constant 0 : index
    %6 = vector.load %arg3[%c0_6, %c0_7] : memref<1x1xf32, #tpu.memory_space<vmem>>, vector<1x1xf32>
    %7 = arith.addf %5, %6 : vector<1x1xf32>
    %cst_8 = arith.constant 0.000000e+00 : f32
    %cst_9 = arith.constant 6.000000e+00 : f32
    %8 = vector.broadcast %cst_8 : f32 to vector<1x1xf32>
    %9 = arith.maximumf %8, %7 : vector<1x1xf32>
    %10 = vector.broadcast %cst_9 : f32 to vector<1x1xf32>
    %11 = arith.minimumf %10, %9 : vector<1x1xf32>
    %c0_10 = arith.constant 0 : index
    %c0_11 = arith.constant 0 : index
    %12 = vector.load %arg4[%c0_10, %c0_11] : memref<1x4xf32, #tpu.memory_space<vmem>>, vector<1x4xf32>
    %cst_12 = arith.constant dense<0.000000e+00> : vector<1x4xf32>
    %13 = tpu.matmul %11, %12, %cst_12 {dimension_numbers = #tpu.dot_dimension_numbers<[1], [0], [0], [1], [0, 0, 1, 1], [], []>} : vector<1x1xf32>, vector<1x4xf32>, vector<1x4xf32> -> vector<1x4xf32>
    %c0_13 = arith.constant 0 : index
    %c0_14 = arith.constant 0 : index
    %14 = vector.load %arg5[%c0_13, %c0_14] : memref<1x4xf32, #tpu.memory_space<vmem>>, vector<1x4xf32>
    %15 = arith.addf %13, %14 : vector<1x4xf32>
    %16 = arith.negf %15 : vector<1x4xf32>
    %17 = math.exp %16 : vector<1x4xf32>
    %cst_15 = arith.constant 1.000000e+00 : f32
    %18 = vector.broadcast %cst_15 : f32 to vector<1x4xf32>
    %19 = arith.addf %18, %17 : vector<1x4xf32>
    %20 = arith.divf %18, %19 : vector<1x4xf32>
    %c0_16 = arith.constant 0 : index
    %c0_17 = arith.constant 0 : index
    %c0_18 = arith.constant 0 : index
    %21 = vector.load %arg1[%c0_16, %c0_17, %c0_18] : memref<1x4x256xf32, #tpu.memory_space<vmem>>, vector<1x4x256xf32>
    %22 = vector.shape_cast %20 : vector<1x4xf32> to vector<1x4x1xf32>
    %23 = vector.broadcast %22 : vector<1x4x1xf32> to vector<1x4x256xf32>
    %24 = arith.mulf %21, %23 : vector<1x4x256xf32>
    %c0_19 = arith.constant 0 : index
    %c0_20 = arith.constant 0 : index
    %c0_21 = arith.constant 0 : index
    %25 = vector.load %arg6[%c0_19, %c0_20, %c0_21] : memref<1x4x256xf32, #tpu.memory_space<vmem>>, vector<1x4x256xf32>
    tpu.vector_store %arg6[%c0_19, %c0_20, %c0_21], %24 {strides = array<i32>} : memref<1x4x256xf32, #tpu.memory_space<vmem>>, vector<1x4x256xf32>,
    return
  }
  func.func @transform_0(%arg0: i32) -> (i32, i32, i32) {
    %c0_i32 = arith.constant 0 : i32
    %c0_i32_0 = arith.constant 0 : i32
    %c0_i32_1 = arith.constant 0 : i32
    return %arg0, %c0_i32, %c0_i32_0 : i32, i32, i32
  }
  func.func @transform_1(%arg0: i32) -> (i32, i32) {
    %c0_i32 = arith.constant 0 : i32
    %c0_i32_0 = arith.constant 0 : i32
    %c0_i32_1 = arith.constant 0 : i32
    return %c0_i32, %c0_i32_0 : i32, i32
  }
  func.func @transform_2(%arg0: i32) -> (i32, i32) {
    %c0_i32 = arith.constant 0 : i32
    %c0_i32_0 = arith.constant 0 : i32
    %c0_i32_1 = arith.constant 0 : i32
    return %c0_i32, %c0_i32_0 : i32, i32
  }
  func.func @transform_3(%arg0: i32) -> (i32, i32) {
    %c0_i32 = arith.constant 0 : i32
    %c0_i32_0 = arith.constant 0 : i32
    %c0_i32_1 = arith.constant 0 : i32
    return %c0_i32, %c0_i32_0 : i32, i32
  }
  func.func @transform_4(%arg0: i32) -> (i32, i32) {
    %c0_i32 = arith.constant 0 : i32
    %c0_i32_0 = arith.constant 0 : i32
    %c0_i32_1 = arith.constant 0 : i32
    return %c0_i32, %c0_i32_0 : i32, i32
  }
  func.func @transform_5(%arg0: i32) -> (i32, i32, i32) {
    %c0_i32 = arith.constant 0 : i32
    %c0_i32_0 = arith.constant 0 : i32
    %c0_i32_1 = arith.constant 0 : i32
    return %arg0, %c0_i32, %c0_i32_0 : i32, i32, i32
  }
}

</mosaic_0001>

<bundles_post_ra>
// kernel: squeeze_excite.1
= control target key start
LH: loop header
LB: loop body
LE: loop exit
PB: predicated region body
PF: predicated region fallthrough
CT: control target
= control target key end

     0   :  { %s576_s20 = smov 0   ;;  %s609_s0 = inlined_call_operand.vmem [shape: f32[2,4,256], index: 0, kind: input, shape index: {}]   ;;  %s610_s1 = inlined_call_operand.vmem [shape: f32[4,1], index: 1, kind: input, shape index: {}]   ;;  %s611_s2 = inlined_call_operand.<no memory space> [shape: f32[1,1], index: 2, kind: input, shape index: {}]   ;;  %s612_s3 = inlined_call_operand.vmem [shape: f32[1,4], index: 3, kind: input, shape index: {}]   ;;  %s613_s4 = inlined_call_operand.vmem [shape: f32[1,4], index: 4, kind: input, shape index: {}]   ;;  %s614_s5 = inlined_call_operand.vmem [shape: f32[2,4,256], index: 5, kind: output, shape index: {}]  }
   0x1   :  { %v10_v0 = vstv %s611_s2 }
   0x2   :  { %11 = vst [vmem:[#allocation2] sm:$0x1] %v10_v0 }
   0x3 LB: > { %s484_s21 = sadd.s32 4294967295, %s538_s20   ;;  %p488_p0 = scmp.ge.s32.totalorder %s538_s20, 1  ;;  %s538_s20 = sphi %s576_s20, %s17_s20  }
   0x4   : > { %p189_p1 = scmp.lt.s32.totalorder %s538_s20, 3 }
   0x6   : > { %p190_p2 = pnand %p488_p0, %p189_p1 }
   0x7   : > { %p217_p3 = scmp.lt.s32.totalorder (!%p190_p2), %s484_s21, 1  ;;  %vm231_vm0 = vcmask (!%p190_p2), 1043456   ;;  %v540_v6 = vmov (!%p190_p2), 0.0   ;;  %v238_v7 = vld [vmem:[%s610_s1] sm:$0xf] (!%p190_p2)  ;;  %vm541_vm1 = vmmov (!%p190_p2), 0   ;;  %v241_v8 = vlaneseq (!%p190_p2) }
   0x8   : > { %193 = sbr.rel (%p190_p2) target bundleno = 750 (0x2ee), region = 40  ;;  %506 = vmatprep.subr.mxu0 (!%p190_p2), %v540_v6  ;;  %511 = vmatprep.subr.mxu1 (!%p190_p2), %v540_v6  ;;  %vm247_vm2 = vcmask (!%p190_p2), 31744   ;;  %v325_v15 = vld [vmem:[%s612_s3] sm:$0x1] (!%p190_p2)  ;;  %vm331_vm3 = vcmask (!%p190_p2), 1040384   ;;  %vm327_vm4 = vcmask (!%p190_p2), 7168  }
   0x9   : > { %507 = vmatpush3.msk.msra.mxu0 (!%p190_p2), %vm231_vm0, %v238_v7  ;;  %508 = vmatprep.mubr.msk.f32.mxu0 (!%p190_p2), %vm541_vm1, %v540_v6  ;;  %v242_v9 = vand.u32 (!%p190_p2), 127, %v241_v8  ;;  %v244_v10 = vshrl.u32 (!%p190_p2), %v241_v8, 7  ;;  %v239_v16 = vld [vmem:[#allocation2] sm:$0x1] (!%p190_p2)  ;;  %v542_v32 = vmov (!%p190_p2), 839922192  }
   0xa   : > { %513 = vmatprep.mubr.msk.f32.mxu1 (!%p190_p2), %vm541_vm1, %v540_v6  ;;  %512 = vmatpush3.msk.msra.mxu1 (!%p190_p2), %vm331_vm3, %v325_v15  ;;  %v326_v22 = vld [vmem:[%s613_s4] sm:$0x1] (!%p190_p2)  ;;  %v420_v33 = vunpack.c.l.s4 (!%p190_p2), %v542_v32 }
   0xb   : > { %v245_v11 = vsub.s32 (!%p190_p2), %v242_v9, %v244_v10  ;;  %v413_v29 = vsub.s32 (!%p190_p2), 0, %v244_v10 }
   0xc   : > { %v421_v34 = vunpack.c.0.s8 (!%p190_p2), %v420_v33 }
   0xe   : > { %v424_v35 = vsub.s32 (!%p190_p2), %v421_v34, %v244_v10 }
   0xf   : > { %s616_s21 = smov (!%p217_p3, %s484_s21), 1 }
  0x10   : > { %s500_s2 = sshll.u32 %s616_s21, 3 }
  0x11   : > { %s221_s24 = scalar_lea.vmem %s609_s0, %s500_s2  ;;  %s226_s8 = scalar_lea.vmem %s614_s5, %s500_s2 }
  0x12   : > { %v227_v1 = vld [vmem:[%s221_s24] sm:$0xff] }
  0x13   : > { %v229_v2 = vcombine.high %v227_v1, %v227_v1  ;;  %v232_v3 = vsel %vm231_vm0, %v227_v1, 0.0 }
  0x15   : > { %v233_v4 = vsel %vm231_vm0, %v229_v2, 0.0 }
  0x16   : > { %v234_v5 = vadd.f32 %v233_v4, %v232_v3 }
  0x18   : > { %235 = vadd.xlane.f32.xlu0 %v234_v5 }
  0xa5   : > { %v236_v12 = vpop.xlane.xlu0 %235 }
  0xa6   : > { %v237_v13 = vmul.f32 0.00390625, %v236_v12 }
  0xa8   : > { %v246_v14 = vrot.slane %v237_v13, %v245_v11 }
  0xaa   : > { %509 = vmatmul.mubr.msk.f32.vlgmr.msra.gmra.mrb[0].mxu0 %vm247_vm2, %v246_v14 }
 0x17d   : > { %v319_v17 = vpop.f32.mrb[0].mxu0 }
 0x17e   : > { %v320_v18 = vadd.f32 %v319_v17, %v239_v16  ;;  %v510_v19 = vpop.f32.mrb[1].mxu0 }
 0x180   : > { %v323_v20 = vmax.f32 %v320_v18, 0.0 }
 0x182   : > { %v324_v21 = vmin.f32 %v323_v20, 6.0 }
 0x184   : > { %514 = vmatmul.mubr.msk.f32.vlgmr.msra.gmra.mrb[0].mxu1 %vm327_vm4, %v324_v21 }
 0x257   : > { %v401_v23 = vpop.f32.mrb[0].mxu1 }
 0x258   : > { %v402_v24 = vadd.f32 %v401_v23, %v326_v22  ;;  %v515_v25 = vpop.f32.mrb[1].mxu1 }
 0x25a   : > { %v497_v26 = vmul.f32 -1.442695, %v402_v24 }
 0x25c   : > { %528 = vpow2.f32 %v497_v26 }
 0x266   : > { %v529_v27 = vpop.eup %528 }
 0x267   : > { %v408_v28 = vadd.f32 1.0, %v529_v27 }
 0x269   : > { %530 = vrcp.f32 %v408_v28 }
 0x273   : > { %v531_v30 = vpop.eup %530 }
 0x274   : > { %v414_v31 = vrot.slane %v531_v30, %v413_v29 }
 0x276   : > { %416 = vbcast.lane.b32.xlu0 %v414_v31, 256 }
 0x2e8   : > { %v417_v36 = vpop.permute.xlu0 %416 }
 0x2e9   : > { %v425_v37 = vrot.slane %v417_v36, %v424_v35 }
 0x2eb   : > { %v427_v38 = vmul.f32 %v425_v37, %v227_v1 }
 0x2ed   : > { %428 = vst [vmem:[%s226_s8] sm:$0xff] %v427_v38 }
 0x2ee PF: > { %s17_s20 = sadd.s32 1, %s538_s20  }
 0x2ef   : > { %p14_p4 = scmp.ge.s32.totalorder %s17_s20, 4  }
 0x2f1   :  { %16 = sbr.rel (!%p14_p4) target bundleno = 3 (0x3), region = 70 }

</bundles_post_ra>
